<compile_context>
chip_gen: v7x
topology: tpu7x:2x2x1
jax: 0.10.0
libtpu: 0.0.40
codegen_flags: <defaults>
</compile_context>

<pallas_src>
import math
from functools import partial

import jax
import jax.numpy as jnp
import numpy as np
from jax.experimental import pallas as pl
from jax.experimental.pallas import tpu as pltpu


def _collapse_mha_kernel(x_ref, wkq_ref, bkq_ref, wv_ref, bv_ref, wo_ref, bo_ref,
                         o_ref, *, bb, seq_len, embed_dim):
    S, E = seq_len, embed_dim

    # (bb, S, E) -> (bb*S, E): one big lane-dense MXU operand (bf16).
    x2d = x_ref[...].reshape(bb * S, E)

    # Per-head attention scores. The query, the 1/sqrt(Dh) scale, the per-head
    # segment-sum and the broadcast across each head's Dh lanes are all folded into
    # wkq/bkq in the wrapper, so s[b, t, e] == score(b, t, head(e)).
    s = jnp.dot(x2d, wkq_ref[...], preferred_element_type=jnp.float32)
    s = (s + bkq_ref[...]).reshape(bb, S, E)

    # Value projection.
    v = jnp.dot(x2d, wv_ref[...], preferred_element_type=jnp.float32)
    v = (v + bv_ref[...]).reshape(bb, S, E)

    # Softmax over the sequence axis (f32), fused with the weighted value sum.
    s = s - jnp.max(s, axis=1, keepdims=True)
    e = jnp.exp(s)
    num = jnp.sum(e * v, axis=1)                          # (bb, E)
    den = jnp.sum(e, axis=1)                              # (bb, E)
    attn = num * pl.reciprocal(den, approx=True)          # (bb, E)

    # Output projection.
    out = jnp.dot(attn.astype(wo_ref.dtype), wo_ref[...],
                  preferred_element_type=jnp.float32) + bo_ref[...]
    o_ref[...] = out.astype(o_ref.dtype)


def _pick_batch_block(B, S, E):
    """Pick how many batch rows to process per grid step."""
    # Target >= 256 MXU rows (BB*S) per step; cap the bf16 x tile at ~2 MiB so
    # double-buffered inputs stay well inside v7x's 64 MiB VMEM.
    bb = max(1, pl.cdiv(256, S))
    max_bb = max(1, (2 * 1024 * 1024) // (2 * S * E))
    bb = min(bb, max_bb, B)
    if bb >= B:
        # One step would cover the whole batch: split in two when each half still
        # feeds the MXU decently, so v7x's two TensorCores both get work.
        if B >= 2 and (B // 2) * S >= 128:
            bb = pl.cdiv(B, 2)
        else:
            return B
    # Sublane-align the (bb, E) output block when it does not cover the whole batch.
    if bb < B:
        bb = min(B, ((bb + 7) // 8) * 8)
    return bb


def collapse_mha(x, params, *, embed_dim, num_heads):
    """x: (B, *, E) -> (B, E)"""
    B = x.shape[0]
    E = embed_dim
    H = num_heads
    assert E % H == 0
    Dh = E // H

    x = x.reshape(B, -1, E)                                   # (B, S, E)
    S = x.shape[1]
    out_dtype = x.dtype

    f32 = jnp.float32
    q_emb = params["query_embedding"].astype(f32)             # (1, E)
    w_in = params["in_proj_weight"].astype(f32)               # (3E, E)
    b_in = params["in_proj_bias"].astype(f32)                 # (3E,)
    w_out = params["out_proj_weight"].astype(f32)             # (E, E)
    b_out = params["out_proj_bias"].astype(f32)               # (E,)

    wq, wk, wv = w_in[:E], w_in[E:2 * E], w_in[2 * E:]
    bq, bk, bv = b_in[:E], b_in[E:2 * E], b_in[2 * E:]

    # Batch-independent query projection, pre-scaled by 1/sqrt(Dh) (hoisted out of the kernel).
    q = (q_emb @ wq.T + bq) * (1.0 / math.sqrt(Dh))           # (1, E)

    # Fold query + per-head segment-sum + lane-broadcast into the key-side weights:
    #   scores_bcast = x @ (Wk^T diag(q) M) + bk diag(q) M
    # with M[e, e'] = [head(e) == head(e')], so each head's scalar score is replicated
    # across its Dh lanes (no per-head slicing or concatenation in the kernel).
    head_id = jnp.arange(E) // Dh
    seg = (head_id[:, None] == head_id[None, :]).astype(f32)  # (E, E) block-diagonal of ones
    qm = q.reshape(E, 1) * seg                                # diag(q_scaled) @ M
    wkq = wk.T @ qm                                           # (E, E)
    bkq = bk.reshape(1, E) @ qm                               # (1, E)

    wv_t = wv.T                                               # (E, E)
    bv2 = bv.reshape(1, E)
    wo_t = w_out.T                                            # (E, E)
    bo = b_out.reshape(1, E)

    # bf16 for the streamed operand and the MXU weights (f32 accumulation in-kernel).
    cdt = jnp.bfloat16
    x_c = x.astype(cdt)
    wkq_c, wv_c, wo_c = wkq.astype(cdt), wv_t.astype(cdt), wo_t.astype(cdt)

    bb = _pick_batch_block(B, S, E)
    Bp = pl.cdiv(B, bb) * bb
    if Bp != B:
        x_c = jnp.pad(x_c, ((0, Bp - B), (0, 0), (0, 0)))

    kernel = partial(_collapse_mha_kernel, bb=bb, seq_len=S, embed_dim=E)

    def const(shape):
        return pl.BlockSpec(shape, lambda i: tuple(0 for _ in shape))

    out = pl.pallas_call(
        kernel,
        out_shape=jax.ShapeDtypeStruct((Bp, E), jnp.float32),
        grid=(Bp // bb,),
        in_specs=[
            pl.BlockSpec((bb, S, E), lambda i: (i, 0, 0)),    # x (per-batch-block tile)
            const((E, E)),                                    # wkq  (resident)
            const((1, E)),                                    # bkq
            const((E, E)),                                    # wv_t
            const((1, E)),                                    # bv
            const((E, E)),                                    # wo_t
            const((1, E)),                                    # bo
        ],
        out_specs=pl.BlockSpec((bb, E), lambda i: (i, 0)),
        compiler_params=pltpu.CompilerParams(
            dimension_semantics=("parallel",),
            vmem_limit_bytes=32 * 1024 * 1024,
        ),
    )(x_c, wkq_c, bkq, wv_c, bv2, wo_c, bo)

    return out[:B].astype(out_dtype)


def collapse_mha_reference(x, params, *, embed_dim, num_heads):
    """Pure-JAX f32 reference mirroring torch.nn.MultiheadAttention (eval)."""
    B = x.shape[0]
    x = x.reshape(B, -1, embed_dim)
    S = x.shape[1]
    E, H = embed_dim, num_heads
    Dh = E // H

    q_emb = jnp.broadcast_to(params["query_embedding"], (B, 1, E))
    w_in, b_in = params["in_proj_weight"], params["in_proj_bias"]
    wq, wk, wv = w_in[:E], w_in[E:2 * E], w_in[2 * E:]
    bq, bk, bv = b_in[:E], b_in[E:2 * E], b_in[2 * E:]

    q = q_emb @ wq.T + bq                                     # (B, 1, E)
    k = x @ wk.T + bk                                         # (B, S, E)
    v = x @ wv.T + bv                                         # (B, S, E)

    q = q.reshape(B, 1, H, Dh).transpose(0, 2, 1, 3)          # (B, H, 1, Dh)
    k = k.reshape(B, S, H, Dh).transpose(0, 2, 1, 3)          # (B, H, S, Dh)
    v = v.reshape(B, S, H, Dh).transpose(0, 2, 1, 3)          # (B, H, S, Dh)

    s = jnp.einsum("bhqd,bhkd->bhqk", q, k) / math.sqrt(Dh)   # (B, H, 1, S)
    p = jax.nn.softmax(s, axis=-1)
    o = jnp.einsum("bhqk,bhkd->bhqd", p, v)                   # (B, H, 1, Dh)
    o = o.transpose(0, 2, 1, 3).reshape(B, 1, E)
    o = o @ params["out_proj_weight"].T + params["out_proj_bias"]
    return o.reshape(B, E)


def init_params(key, embed_dim):
    E = embed_dim
    k0, k1, k2, k3 = jax.random.split(key, 4)
    bound = 1.0 / math.sqrt(E)
    return {
        "query_embedding": jax.random.normal(k0, (1, E), jnp.float32),
        "in_proj_weight": jax.random.uniform(k1, (3 * E, E), jnp.float32,
                                             minval=-bound, maxval=bound),
        "in_proj_bias": jnp.zeros((3 * E,), jnp.float32),
        "out_proj_weight": jax.random.uniform(k2, (E, E), jnp.float32,
                                              minval=-bound, maxval=bound),
        "out_proj_bias": jax.random.uniform(k3, (E,), jnp.float32,
                                            minval=-bound, maxval=bound),
    }


if __name__ == "__main__":
    B, E, H = 2, 32, 4
    key = jax.random.PRNGKey(0)
    kx, kp = jax.random.split(key)

    # X: (batch, *, embedding_dim) — here * = (4, 4), flattened to S=16 inside.
    x = jax.random.normal(kx, (B, 4, 4, E), jnp.float32)
    params = init_params(kp, E)

    out = collapse_mha(x, params, embed_dim=E, num_heads=H)
    out = jax.block_until_ready(out)

    ref = collapse_mha_reference(x, params, embed_dim=E, num_heads=H)
    # bf16 streamed operands / weights -> loosened tolerance vs the f32 reference.
    np.testing.assert_allclose(np.asarray(out), np.asarray(ref),
                               rtol=3e-2, atol=3e-2)
    assert out.shape == (B, E)
    print("KERNEL_OK")
</pallas_src>

<mosaic_0001>
module attributes {stable_mosaic.version = 11 : i64} {
  func.func @_collapse_mha_kernel(%arg0: i32, %arg1: memref<2x16x32xbf16, #tpu.memory_space<vmem>>, %arg2: memref<32x32xbf16, #tpu.memory_space<vmem>>, %arg3: memref<1x32xf32, #tpu.memory_space<vmem>>, %arg4: memref<32x32xbf16, #tpu.memory_space<vmem>>, %arg5: memref<1x32xf32, #tpu.memory_space<vmem>>, %arg6: memref<32x32xbf16, #tpu.memory_space<vmem>>, %arg7: memref<1x32xf32, #tpu.memory_space<vmem>>, %arg8: memref<2x32xf32, #tpu.memory_space<vmem>>) attributes {dimension_semantics = [#tpu.dimension_semantics<parallel>], iteration_bounds = array<i64: 1>, scalar_prefetch = 0 : i64, scratch_operands = 0 : i64, tpu.core_type = #tpu.core_type<tc>, window_params = [{transform_indices = @transform_0, window_bounds = array<i64: 2, 16, 32>}, {pipeline_mode = #tpu.pipeline_mode<synchronous>, transform_indices = @transform_1, window_bounds = array<i64: 32, 32>}, {pipeline_mode = #tpu.pipeline_mode<synchronous>, transform_indices = @transform_2, window_bounds = array<i64: 1, 32>}, {pipeline_mode = #tpu.pipeline_mode<synchronous>, transform_indices = @transform_3, window_bounds = array<i64: 32, 32>}, {pipeline_mode = #tpu.pipeline_mode<synchronous>, transform_indices = @transform_4, window_bounds = array<i64: 1, 32>}, {pipeline_mode = #tpu.pipeline_mode<synchronous>, transform_indices = @transform_5, window_bounds = array<i64: 32, 32>}, {pipeline_mode = #tpu.pipeline_mode<synchronous>, transform_indices = @transform_6, window_bounds = array<i64: 1, 32>}, {transform_indices = @transform_7, window_bounds = array<i64: 2, 32>}]} {
    %c0 = arith.constant 0 : index
    %c0_0 = arith.constant 0 : index
    %c0_1 = arith.constant 0 : index
    %0 = vector.load %arg1[%c0, %c0_0, %c0_1] : memref<2x16x32xbf16, #tpu.memory_space<vmem>>, vector<2x16x32xbf16>
    %1 = vector.shape_cast %0 : vector<2x16x32xbf16> to vector<32x32xbf16>
    %c0_2 = arith.constant 0 : index
    %c0_3 = arith.constant 0 : index
    %2 = vector.load %arg2[%c0_2, %c0_3] : memref<32x32xbf16, #tpu.memory_space<vmem>>, vector<32x32xbf16>
    %cst = arith.constant dense<0.000000e+00> : vector<32x32xf32>
    %3 = tpu.matmul %1, %2, %cst {dimension_numbers = #tpu.dot_dimension_numbers<[1], [0], [0], [1], [0, 0, 1, 1], [], []>} : vector<32x32xbf16>, vector<32x32xbf16>, vector<32x32xf32> -> vector<32x32xf32>
    %c0_4 = arith.constant 0 : index
    %c0_5 = arith.constant 0 : index
    %4 = vector.load %arg3[%c0_4, %c0_5] : memref<1x32xf32, #tpu.memory_space<vmem>>, vector<1x32xf32>
    %5 = vector.broadcast %4 : vector<1x32xf32> to vector<32x32xf32>
    %6 = arith.addf %3, %5 : vector<32x32xf32>
    %7 = vector.shape_cast %6 : vector<32x32xf32> to vector<2x16x32xf32>
    %c0_6 = arith.constant 0 : index
    %c0_7 = arith.constant 0 : index
    %8 = vector.load %arg4[%c0_6, %c0_7] : memref<32x32xbf16, #tpu.memory_space<vmem>>, vector<32x32xbf16>
    %cst_8 = arith.constant dense<0.000000e+00> : vector<32x32xf32>
    %9 = tpu.matmul %1, %8, %cst_8 {dimension_numbers = #tpu.dot_dimension_numbers<[1], [0], [0], [1], [0, 0, 1, 1], [], []>} : vector<32x32xbf16>, vector<32x32xbf16>, vector<32x32xf32> -> vector<32x32xf32>
    %c0_9 = arith.constant 0 : index
    %c0_10 = arith.constant 0 : index
    %10 = vector.load %arg5[%c0_9, %c0_10] : memref<1x32xf32, #tpu.memory_space<vmem>>, vector<1x32xf32>
    %11 = vector.broadcast %10 : vector<1x32xf32> to vector<32x32xf32>
    %12 = arith.addf %9, %11 : vector<32x32xf32>
    %13 = vector.shape_cast %12 : vector<32x32xf32> to vector<2x16x32xf32>
    %cst_11 = arith.constant dense<0xFF800000> : vector<2x32xf32>
    %14 = vector.multi_reduction <maximumf>, %7, %cst_11 [1] : vector<2x16x32xf32> to vector<2x32xf32>
    %15 = vector.shape_cast %14 : vector<2x32xf32> to vector<2x1x32xf32>
    %16 = vector.broadcast %15 : vector<2x1x32xf32> to vector<2x16x32xf32>
    %17 = arith.subf %7, %16 : vector<2x16x32xf32>
    %18 = math.exp %17 : vector<2x16x32xf32>
    %19 = arith.mulf %18, %13 : vector<2x16x32xf32>
    %cst_12 = arith.constant dense<0.000000e+00> : vector<2x32xf32>
    %20 = vector.multi_reduction <add>, %19, %cst_12 [1] : vector<2x16x32xf32> to vector<2x32xf32>
    %cst_13 = arith.constant dense<0.000000e+00> : vector<2x32xf32>
    %21 = vector.multi_reduction <add>, %18, %cst_13 [1] : vector<2x16x32xf32> to vector<2x32xf32>
    %22 = tpu.reciprocal %21 {approx = true} : vector<2x32xf32> -> vector<2x32xf32>
    %23 = arith.mulf %20, %22 : vector<2x32xf32>
    %24 = arith.truncf %23 : vector<2x32xf32> to vector<2x32xbf16>
    %c0_14 = arith.constant 0 : index
    %c0_15 = arith.constant 0 : index
    %25 = vector.load %arg6[%c0_14, %c0_15] : memref<32x32xbf16, #tpu.memory_space<vmem>>, vector<32x32xbf16>
    %cst_16 = arith.constant dense<0.000000e+00> : vector<2x32xf32>
    %26 = tpu.matmul %24, %25, %cst_16 {dimension_numbers = #tpu.dot_dimension_numbers<[1], [0], [0], [1], [0, 0, 1, 1], [], []>} : vector<2x32xbf16>, vector<32x32xbf16>, vector<2x32xf32> -> vector<2x32xf32>
    %c0_17 = arith.constant 0 : index
    %c0_18 = arith.constant 0 : index
    %27 = vector.load %arg7[%c0_17, %c0_18] : memref<1x32xf32, #tpu.memory_space<vmem>>, vector<1x32xf32>
    %28 = vector.broadcast %27 : vector<1x32xf32> to vector<2x32xf32>
    %29 = arith.addf %26, %28 : vector<2x32xf32>
    %c0_19 = arith.constant 0 : index
    %c0_20 = arith.constant 0 : index
    %30 = vector.load %arg8[%c0_19, %c0_20] : memref<2x32xf32, #tpu.memory_space<vmem>>, vector<2x32xf32>
    tpu.vector_store %arg8[%c0_19, %c0_20], %29 {strides = array<i32>} : memref<2x32xf32, #tpu.memory_space<vmem>>, vector<2x32xf32>,
    return
  }
  func.func @transform_0(%arg0: i32) -> (i32, i32, i32) {
    %c0_i32 = arith.constant 0 : i32
    %c0_i32_0 = arith.constant 0 : i32
    %c0_i32_1 = arith.constant 0 : i32
    return %arg0, %c0_i32, %c0_i32_0 : i32, i32, i32
  }
  func.func @transform_1(%arg0: i32) -> (i32, i32) {
    %c0_i32 = arith.constant 0 : i32
    %c0_i32_0 = arith.constant 0 : i32
    %c0_i32_1 = arith.constant 0 : i32
    return %c0_i32, %c0_i32_0 : i32, i32
  }
  func.func @transform_2(%arg0: i32) -> (i32, i32) {
    %c0_i32 = arith.constant 0 : i32
    %c0_i32_0 = arith.constant 0 : i32
    %c0_i32_1 = arith.constant 0 : i32
    return %c0_i32, %c0_i32_0 : i32, i32
  }
  func.func @transform_3(%arg0: i32) -> (i32, i32) {
    %c0_i32 = arith.constant 0 : i32
    %c0_i32_0 = arith.constant 0 : i32
    %c0_i32_1 = arith.constant 0 : i32
    return %c0_i32, %c0_i32_0 : i32, i32
  }
  func.func @transform_4(%arg0: i32) -> (i32, i32) {
    %c0_i32 = arith.constant 0 : i32
    %c0_i32_0 = arith.constant 0 : i32
    %c0_i32_1 = arith.constant 0 : i32
    return %c0_i32, %c0_i32_0 : i32, i32
  }
  func.func @transform_5(%arg0: i32) -> (i32, i32) {
    %c0_i32 = arith.constant 0 : i32
    %c0_i32_0 = arith.constant 0 : i32
    %c0_i32_1 = arith.constant 0 : i32
    return %c0_i32, %c0_i32_0 : i32, i32
  }
  func.func @transform_6(%arg0: i32) -> (i32, i32) {
    %c0_i32 = arith.constant 0 : i32
    %c0_i32_0 = arith.constant 0 : i32
    %c0_i32_1 = arith.constant 0 : i32
    return %c0_i32, %c0_i32_0 : i32, i32
  }
  func.func @transform_7(%arg0: i32) -> (i32, i32) {
    %c0_i32 = arith.constant 0 : i32
    %c0_i32_0 = arith.constant 0 : i32
    return %arg0, %c0_i32 : i32, i32
  }
}

</mosaic_0001>

<bundles_post_ra>
// kernel: tpu_custom_call.1
= control target key start
LH: loop header
LB: loop body
LE: loop exit
PB: predicated region body
PF: predicated region fallthrough
CT: control target
= control target key end

     0   :  { %12 = vsyncpa [#allocation3], 0  ;;  %s718_s0 = inlined_call_operand.hbm [shape: bf16[2,16,32], index: 0, kind: input, shape index: {}]   ;;  %s719_s1 = inlined_call_operand.hbm [shape: bf16[32,32], index: 1, kind: input, shape index: {}]   ;;  %s720_s2 = inlined_call_operand.vmem [shape: f32[1,32], index: 2, kind: input, shape index: {}]   ;;  %s721_s3 = inlined_call_operand.hbm [shape: bf16[32,32], index: 3, kind: input, shape index: {}]   ;;  %s722_s4 = inlined_call_operand.vmem [shape: f32[1,32], index: 4, kind: input, shape index: {}]   ;;  %s723_s5 = inlined_call_operand.vmem [shape: bf16[32,32], index: 5, kind: input, shape index: {}]   ;;  %s724_s6 = inlined_call_operand.vmem [shape: f32[1,32], index: 6, kind: input, shape index: {}]   ;;  %s725_s7 = inlined_call_operand.hbm [shape: f32[2,32], index: 7, kind: output, shape index: {}]  }
   0x1   :  { %13 = vsyncpa [#allocation6], 0 }
   0x2   :  { %14 = vsyncpa [#allocation4], 0  ;;  %s574_s24 = smov [#allocation5]   ;;  %s575_s26 = smov [#allocation2]  }
   0x3   :  { %s32_s25 = sshll.u32 %s574_s24, 4  ;;  %s20_s27 = sshll.u32 %s575_s26, 4  ;;  %s33_s25 = int_to_ptr.vmem [resolvable:$true] %s32_s25  ;;  %s622_s27 = int_to_ptr.vmem [resolvable:$true] %s20_s27 }
   0x4   :  { %s480_s30 = scalar_lea.hbm %s719_s1, 256 }
   0x5   :  { %p481_p0 = scmp.ne.s32.totalorder %s719_s1, %s480_s30  ;;  %p484_p1 = scmp.lt.u32.totalorder %s480_s30, %s719_s1 }
   0x7   :  { %p486_p2 = pnand %p484_p1, %p481_p0 }
   0x9   :  { %489 = shalt.err (!%p486_p2)
}
   0xa   :  { %s490_s12 = scalar_lea.vmem %s33_s25, 256  ;;  %p495_p4 = scmp.lt.s32.totalorder %s33_s25, %s33_s25 }
   0xb   :  { %p491_p3 = scmp.ne.s32.totalorder %s33_s25, %s490_s12  ;;  %p496_p5 = scmp.lt.s32.totalorder %s490_s12, %s490_s12 }
   0xd   :  { %p497_p6 = por %p496_p5, %p495_p4 }
   0xf   :  { %p498_p7 = pnand %p497_p6, %p491_p3 }
  0x11   :  { %501 = shalt.err (!%p498_p7)
}
  0x12   :  { %s576_s13 = smov 64   ;;  %s577_s14 = smov 4  }
  0x13   :  { %38 = dma.hbm_to_vmem [thread:$0]  %s719_s1, 256, %s33_s25, [#allocation6], %s576_s13, %s576_s13, %s577_s14  }
  0x14   :  { %s502_s19 = scalar_lea.hbm %s718_s0, 256 }
  0x15   :  { %p503_p8 = scmp.ne.s32.totalorder %s718_s0, %s502_s19  ;;  %p506_p9 = scmp.lt.u32.totalorder %s502_s19, %s718_s0 }
  0x17   :  { %p508_p10 = pnand %p506_p9, %p503_p8 }
  0x19   :  { %511 = shalt.err (!%p508_p10)
}
  0x1a   :  { %s512_s24 = scalar_lea.vmem %s622_s27, 256  ;;  %p517_p12 = scmp.lt.s32.totalorder %s622_s27, %s622_s27 }
  0x1b   :  { %p513_p11 = scmp.ne.s32.totalorder %s622_s27, %s512_s24  ;;  %p518_p13 = scmp.lt.s32.totalorder %s512_s24, %s512_s24 }
  0x1d   :  { %p519_p0 = por %p518_p13, %p517_p12 }
  0x1f   :  { %p520_p1 = pnand %p519_p0, %p513_p11 }
  0x21   :  { %523 = shalt.err (!%p520_p1)
}
  0x22   :  { %26 = dma.hbm_to_vmem [thread:$0]  %s718_s0, 256, %s622_s27, [#allocation3], %s576_s13, %s576_s13, %s577_s14  }
  0x23   :  { %s578_s26 = smov [#allocation7]   ;;  %s524_s8 = scalar_lea.hbm %s721_s3, 256 }
  0x24   :  { %s46_s28 = sshll.u32 %s578_s26, 4  ;;  %p525_p2 = scmp.ne.s32.totalorder %s721_s3, %s524_s8  ;;  %s47_s28 = int_to_ptr.vmem [resolvable:$true] %s46_s28 }
  0x25   :  { %p528_p3 = scmp.lt.u32.totalorder %s524_s8, %s721_s3 }
  0x27   :  { %p530_p4 = pnand %p528_p3, %p525_p2 }
  0x29   :  { %533 = shalt.err (!%p530_p4)
}
  0x2a   :  { %s534_s15 = scalar_lea.vmem %s47_s28, 256  ;;  %p539_p6 = scmp.lt.s32.totalorder %s47_s28, %s47_s28 }
  0x2b   :  { %p535_p5 = scmp.ne.s32.totalorder %s47_s28, %s534_s15  ;;  %p540_p7 = scmp.lt.s32.totalorder %s534_s15, %s534_s15 }
  0x2d   :  { %p541_p8 = por %p540_p7, %p539_p6 }
  0x2f   :  { %p542_p9 = pnand %p541_p8, %p535_p5 }
  0x31   :  { %545 = shalt.err (!%p542_p9)
}
  0x32   :  { %52 = dma.hbm_to_vmem [thread:$0]  %s721_s3, 256, %s47_s28, [#allocation6], %s576_s13, %s576_s13, %s577_s14  }
  0x33   :  { %568 = dma.done.wait [#allocation3], 256  }
  0x34   :  { %569 = vsyncadd [#allocation3], 4294967040 }
  0x35   :  { %570 = dma.done.wait [#allocation6], 512  }
  0x36   :  { %571 = vsyncadd [#allocation6], 4294966784  ;;  %v460_v0 = vld [vmem:[#allocation5] sm:$0xff]   ;;  %v461_v1 = vld [vmem:[#allocation5 + $0x8] sm:$0xff]   ;;  %vm106_vm0 = vcmask 261120   ;;  %v579_v7 = vmov 0.0  }
  0x37   :  { %428 = vmatprep.subr.bf16.mxu0 %v460_v0  ;;  %v462_v2 = vld [vmem:[#allocation2] sm:$0xff]   ;;  %v463_v3 = vld [vmem:[#allocation2 + $0x8] sm:$0xff]   ;;  %vm580_vm1 = vmmov 0   ;;  %vm325_vm2 = vcmask 1041409   ;;  %s581_s20 = smov [#allocation8]   ;;  %vm383_vm3 = vcmask 254976  }
  0x38   :  { %429 = vmatpush3.bf16.msra.mxu0 %v460_v0  ;;  %432 = vmatprep.mubr.msk.bf16.mxu0 %vm106_vm0, %v462_v2  ;;  %v464_v4 = vld [vmem:[#allocation7] sm:$0xff]   ;;  %v465_v5 = vld [vmem:[#allocation7 + $0x8] sm:$0xff]   ;;  %s391_s21 = sshll.u32 %s581_s20, 4  ;;  %s392_s21 = int_to_ptr.vmem [resolvable:$true] %s391_s21 }
  0x39   :  { %430 = vmatprep.subr.bf16.mxu0 %v461_v1  ;;  %440 = vmatprep.mubr.msk.bf16.mxu1 %vm106_vm0, %v462_v2  ;;  %v466_v6 = vld [vmem:[%s723_s5] sm:$0xff]   ;;  %v467_v8 = vld [vmem:[%s723_s5 + $0x8] sm:$0xff]   ;;  %s546_s22 = scalar_lea.vmem %s392_s21, 32  ;;  %p551_p11 = scmp.lt.s32.totalorder %s392_s21, %s392_s21 }
  0x3a   :  { %436 = vmatprep.subr.bf16.mxu1 %v464_v4  ;;  %v401_v9 = vld [vmem:[%s720_s2] ss:$0 sm:$0xff]  ;;  %p547_p10 = scmp.ne.s32.totalorder %s392_s21, %s546_s22  ;;  %p552_p12 = scmp.lt.s32.totalorder %s546_s22, %s546_s22 }
  0x3b   :  { %437 = vmatpush3.bf16.msra.mxu1 %v464_v4  ;;  %v408_v48 = vld [vmem:[%s722_s4] ss:$0 sm:$0xff] }
  0x3c   :  { %431 = vmatpush3.bf16.msra.mxu0 %v461_v1  ;;  %438 = vmatprep.subr.bf16.mxu1 %v465_v5  ;;  %p553_p13 = por %p552_p12, %p551_p11 }
  0x3d   :  { %444 = vmatprep.subr.bf16.mxu0 %v579_v7 }
  0x3e   :  { %p554_p0 = pnand %p553_p13, %p547_p10 }
  0x3f   :  { %433 = vmatmul.mubr.msk.bf16.vlgmr.msra.gmra.mrb[0].mxu0 %vm106_vm0, %v463_v3  ;;  %439 = vmatpush3.bf16.msra.mxu1 %v465_v5 }
  0x40   :  { %445 = vmatpush3.bf16.msra.mxu0 %v466_v6  ;;  %448 = vmatprep.mubr.msk.bf16.mxu0 %vm580_vm1, %v579_v7 }
  0x41   :  { %446 = vmatprep.subr.bf16.mxu0 %v579_v7 }
  0x42   :  { %441 = vmatmul.mubr.msk.bf16.vlgmr.msra.gmra.mrb[0].mxu1 %vm106_vm0, %v463_v3 }
  0x44   :  { %447 = vmatpush3.bf16.msra.mxu0 %v467_v8 }
 0x112   :  { %v434_v10 = vpop.f32.mrb[0].mxu0 }
 0x113   :  { %v156_v11 = vadd.f32 %v434_v10, %v401_v9  ;;  %v147_v12 = vpop.f32.mrb[1].mxu0 }
 0x114   :  { %v148_v13 = vadd.f32 %v401_v9, %v147_v12  ;;  %v435_v14 = vpop.f32.mrb[2].mxu0 }
 0x115   :  { %v159_v15 = vadd.f32 %v435_v14, %v401_v9  ;;  %v150_v16 = vpop.f32.mrb[3].mxu0  ;;  %v442_v18 = vpop.f32.mrb[0].mxu1  ;;  %v243_v19 = vsel %vm106_vm0, %v156_v11, -inf }
 0x116   :  { %v151_v17 = vadd.f32 %v401_v9, %v150_v16  ;;  %v219_v21 = vpop.f32.mrb[1].mxu1  ;;  %v234_v22 = vsel %vm106_vm0, %v148_v13, -inf  ;;  %v228_v49 = vadd.f32 %v442_v18, %v408_v48 }
 0x117   :  { %v244_v20 = vsel %vm106_vm0, %v159_v15, -inf  ;;  %v443_v25 = vpop.f32.mrb[2].mxu1  ;;  %v220_v51 = vadd.f32 %v408_v48, %v219_v21 }
 0x118   :  { %v245_v23 = vmax.f32 %v243_v19, %v244_v20  ;;  %v235_v24 = vsel %vm106_vm0, %v151_v17, -inf  ;;  %v222_v27 = vpop.f32.mrb[3].mxu1  ;;  %v231_v50 = vadd.f32 %v443_v25, %v408_v48 }
 0x119   :  { %v236_v26 = vmax.f32 %v234_v22, %v235_v24  ;;  %v223_v53 = vadd.f32 %v408_v48, %v222_v27 }
 0x11a   :  { %v246_v28 = vrot.slane %v245_v23, 4 }
 0x11b   :  { %v237_v29 = vrot.slane %v236_v26, 4 }
 0x11c   :  { %v247_v30 = vmax.f32 %v245_v23, %v246_v28 }
 0x11d   :  { %v238_v31 = vmax.f32 %v236_v26, %v237_v29 }
 0x11e   :  { %v248_v32 = vrot.slane %v247_v30, 2 }
 0x11f   :  { %v239_v33 = vrot.slane %v238_v31, 2 }
 0x120   :  { %v249_v34 = vmax.f32 %v247_v30, %v248_v32 }
 0x121   :  { %v240_v35 = vmax.f32 %v238_v31, %v239_v33 }
 0x122   :  { %v250_v36 = vrot.slane %v249_v34, 1 }
 0x123   :  { %v241_v37 = vrot.slane %v240_v35, 1 }
 0x124   :  { %v251_v38 = vmax.f32 %v249_v34, %v250_v36 }
 0x125   :  { %v242_v39 = vmax.f32 %v240_v35, %v241_v37 }
 0x126   :  { %v254_v40 = vsub.f32 %v156_v11, %v251_v38  ;;  %v255_v41 = vsub.f32 %v159_v15, %v251_v38 }
 0x127   :  { %v252_v42 = vsub.f32 %v148_v13, %v242_v39  ;;  %v253_v43 = vsub.f32 %v151_v17, %v242_v39 }
 0x128   :  { %v260_v44 = vmul.f32 1.442695, %v254_v40  ;;  %v262_v45 = vmul.f32 1.442695, %v255_v41 }
 0x129   :  { %v256_v46 = vmul.f32 1.442695, %v252_v42  ;;  %v258_v47 = vmul.f32 1.442695, %v253_v43  ;;  %v413_v43 = vld [vmem:[%s724_s6] ss:$0 sm:$0xff] }
 0x12a   :  { %468 = vpow2.f32 %v260_v44 }
 0x12b   :  { %470 = vpow2.f32 %v262_v45 }
 0x12c   :  { %472 = vpow2.f32 %v256_v46 }
 0x12d   :  { %474 = vpow2.f32 %v258_v47 }
 0x134   :  { %v469_v52 = vpop.eup %468 }
 0x135   :  { %v471_v54 = vpop.eup %470  ;;  %v295_v55 = vsel %vm106_vm0, %v469_v52, 0.0  ;;  %v266_v56 = vmul.f32 %v469_v52, %v228_v49 }
 0x136   :  { %v473_v57 = vpop.eup %472  ;;  %v296_v58 = vsel %vm106_vm0, %v471_v54, 0.0  ;;  %v267_v59 = vmul.f32 %v471_v54, %v231_v50 }
 0x137   :  { %v475_v60 = vpop.eup %474  ;;  %v297_v61 = vadd.f32 %v296_v58, %v295_v55  ;;  %v286_v62 = vsel %vm106_vm0, %v473_v57, 0.0  ;;  %v277_v63 = vsel %vm106_vm0, %v266_v56, 0.0  ;;  %v264_v0 = vmul.f32 %v473_v57, %v220_v51 }
 0x138   :  { %v287_v1 = vsel %vm106_vm0, %v475_v60, 0.0  ;;  %v278_v2 = vsel %vm106_vm0, %v267_v59, 0.0  ;;  %v265_v3 = vmul.f32 %v475_v60, %v223_v53 }
 0x139   :  { %v298_v4 = vrot.slane %v297_v61, 4  ;;  %v288_v5 = vadd.f32 %v287_v1, %v286_v62  ;;  %v268_v6 = vsel %vm106_vm0, %v264_v0, 0.0  ;;  %v279_v7 = vadd.f32 %v278_v2, %v277_v63 }
 0x13a   :  { %v269_v8 = vsel %vm106_vm0, %v265_v3, 0.0 }
 0x13b   :  { %v299_v9 = vadd.f32 %v298_v4, %v297_v61  ;;  %v289_v10 = vrot.slane %v288_v5, 4  ;;  %v280_v11 = vrot.slane %v279_v7, 4  ;;  %v270_v12 = vadd.f32 %v269_v8, %v268_v6 }
 0x13d   :  { %v300_v13 = vrot.slane %v299_v9, 2  ;;  %v290_v14 = vadd.f32 %v289_v10, %v288_v5  ;;  %v271_v15 = vrot.slane %v270_v12, 4  ;;  %v281_v16 = vadd.f32 %v280_v11, %v279_v7 }
 0x13f   :  { %v301_v17 = vadd.f32 %v300_v13, %v299_v9  ;;  %v291_v18 = vrot.slane %v290_v14, 2  ;;  %v272_v19 = vadd.f32 %v271_v15, %v270_v12  ;;  %v282_v22 = vrot.slane %v281_v16, 2 }
 0x141   :  { %v302_v20 = vrot.slane %v301_v17, 1  ;;  %v292_v21 = vadd.f32 %v291_v18, %v290_v14  ;;  %v273_v25 = vrot.slane %v272_v19, 2  ;;  %v283_v27 = vadd.f32 %v282_v22, %v281_v16 }
 0x143   :  { %v303_v23 = vadd.f32 %v302_v20, %v301_v17  ;;  %v293_v24 = vrot.slane %v292_v21, 1  ;;  %v274_v28 = vadd.f32 %v273_v25, %v272_v19  ;;  %v284_v29 = vrot.slane %v283_v27, 1 }
 0x145   :  { %476 = vrcp.f32 %v303_v23  ;;  %v294_v26 = vadd.f32 %v293_v24, %v292_v21  ;;  %v275_v30 = vrot.slane %v274_v28, 1  ;;  %v285_v31 = vadd.f32 %v284_v29, %v283_v27 }
 0x147   :  { %478 = vrcp.f32 %v294_v26  ;;  %v276_v34 = vadd.f32 %v275_v30, %v274_v28 }
 0x14f   :  { %v477_v32 = vpop.eup %476 }
 0x150   :  { %v307_v33 = vmul.f32 %v477_v32, %v285_v31 }
 0x151   :  { %v479_v35 = vpop.eup %478 }
 0x152   :  { %v309_v36 = vpack.c.bf16 %v307_v33, %v307_v33  ;;  %v306_v37 = vmul.f32 %v479_v35, %v276_v34 }
 0x154   :  { %v324_v38 = vunpack.c.l.b16 %v309_v36  ;;  %v308_v39 = vpack.c.bf16 %v306_v37, %v306_v37 }
 0x156   :  { %v323_v40 = vunpack.c.l.b16 %v308_v39 }
 0x158   :  { %v326_v41 = vsel %vm325_vm2, %v324_v38, %v323_v40 }
 0x159   :  { %v327_v42 = vpack.c.b16 %v326_v41, %v326_v41 }
 0x15b   :  { %449 = vmatmul.mubr.msk.bf16.vlgmr.msra.gmra.mrb[4].mxu0 %vm106_vm0, %v327_v42 }
 0x22e   :  { %v377_v44 = vpop.f32.mrb[4].mxu0 }
 0x22f   :  { %v378_v45 = vadd.f32 %v413_v43, %v377_v44  ;;  %v450_v46 = vpop.f32.mrb[5].mxu0 }
 0x230   :  { %v380_v47 = vpop.f32.mrb[6].mxu0 }
 0x231   :  { %v451_v48 = vpop.f32.mrb[7].mxu0  ;;  %384 = vst.msk [vmem:[#allocation8] sm:$0x3] %vm383_vm3, %v378_v45 }
 0x232   :  { %557 = shalt.err (!%p554_p0)
}
 0x233   :  { %s558_s6 = scalar_lea.hbm %s725_s7, 32 }
 0x234   :  { %p559_p1 = scmp.ne.s32.totalorder %s725_s7, %s558_s6  ;;  %p562_p2 = scmp.lt.u32.totalorder %s558_s6, %s725_s7 }
 0x236   :  { %p564_p3 = pnand %p562_p2, %p559_p1 }
 0x238   :  { %567 = shalt.err (!%p564_p3)
}
 0x239   :  { %394 = dma.vmem_to_hbm [thread:$0]  %s392_s21, 32, %s725_s7, [#allocation4]  }
 0x23a   :  { %572 = dma.done.wait [#allocation4], 32  }
 0x23b   :  { %573 = vsyncadd [#allocation4], 4294967264 }
 0x23c   :  { %398 = vsyncpa [#allocation3], 1 }
 0x23d   :  { %399 = vsyncpa [#allocation6], 1 }
 0x23e   :  { %400 = vsyncpa [#allocation4], 1 }

</bundles_post_ra>
